<compile_context>
chip_gen: v5e
topology: v5e:2x2
jax: 0.10.0
libtpu: 0.0.40
codegen_flags: <defaults>
</compile_context>

<pallas_src>
import jax
import jax.numpy as jnp
from jax.experimental import pallas as pl
from jax.experimental.pallas import tpu as pltpu


def _dwconv_kernel(x_ref, w_ref, b_ref, o_ref, carry_ref):
    # x_ref    : (1, TL, C)  current sequence tile
    # w_ref    : (3, C)      depthwise taps; tap k multiplies x[t - 2 + k]
    # b_ref    : (1, C)      bias
    # o_ref    : (1, TL, C)  output tile
    # carry_ref: (2, C)      last two input rows of the previous sequence tile

    # First sequence tile of each batch element: halo is the implicit left zero-padding.
    @pl.when(pl.program_id(1) == 0)
    def _():
        carry_ref[...] = jnp.zeros_like(carry_ref)

    x = x_ref[0]                               # (TL, C), input dtype
    carry = carry_ref[...]                     # (2, C),  input dtype

    xf = x.astype(jnp.float32)
    cf = carry.astype(jnp.float32)

    # Sequence-shifted views built in VMEM (sublane shifts; no HBM halo traffic).
    xm1 = jnp.concatenate([cf[1:2, :], xf[:-1, :]], axis=0)   # x[t-1]
    xm2 = jnp.concatenate([cf[0:2, :], xf[:-2, :]], axis=0)   # x[t-2]

    # Read taps / bias once per tile.
    w = w_ref[...].astype(jnp.float32)         # (3, C)
    b = b_ref[...].astype(jnp.float32)         # (1, C)

    acc = xm2 * w[0:1, :] + xm1 * w[1:2, :] + xf * w[2:3, :] + b
    o_ref[0, :, :] = acc.astype(o_ref.dtype)

    # Carry the last two input rows into the next sequence tile of this batch element.
    carry_ref[...] = x[-2:, :]


def _round_up(n, m):
    return (n + m - 1) // m * m


def _pick_seq_tile(L, C_pad, itemsize):
    # Cap one (TL, C_pad) buffer at ~4 MiB so input+output, double-buffered, stays well
    # under the scoped-VMEM limits on every generation (v7x: 32 MiB scoped / 64 MiB phys).
    max_rows = max(8, ((4 * 1024 * 1024) // (C_pad * itemsize)) // 8 * 8)
    return min(1024, max_rows, _round_up(L, 8))


def depthwise_conv(x, weight, bias, *, seq_tile=None):
    """Depthwise causal conv (k=3, pad=2, keep first L outputs).

    x: (B, L, C); weight: (C, 1, 3) (PyTorch Conv1d layout); bias: (C,).
    Returns (B, L, C) in x.dtype.
    """
    B, L, C = x.shape
    lane = 128
    C_pad = _round_up(C, lane)

    # Taps to (3, C): tap index on the sublane axis, channels on the lane axis.
    w = jnp.transpose(weight[:, 0, :], (1, 0)).astype(x.dtype)   # (3, C)
    b = bias.reshape(1, C).astype(x.dtype)                       # (1, C)

    if C_pad != C:
        # Lane-dense loads/stores: zero-pad channels (zero weight/bias there), slice after.
        x_in = jnp.pad(x, ((0, 0), (0, 0), (0, C_pad - C)))
        w = jnp.pad(w, ((0, 0), (0, C_pad - C)))
        b = jnp.pad(b, ((0, 0), (0, C_pad - C)))
    else:
        x_in = x

    itemsize = jnp.dtype(x.dtype).itemsize
    TL = seq_tile if seq_tile is not None else _pick_seq_tile(L, C_pad, itemsize)
    assert TL % 8 == 0 and TL >= 8
    n_l = pl.cdiv(L, TL)

    out = pl.pallas_call(
        _dwconv_kernel,
        out_shape=jax.ShapeDtypeStruct((B, L, C_pad), x.dtype),
        grid_spec=pltpu.PrefetchScalarGridSpec(
            num_scalar_prefetch=0,
            grid=(B, n_l),
            in_specs=[
                pl.BlockSpec((1, TL, C_pad), lambda bi, li: (bi, li, 0)),
                pl.BlockSpec((3, C_pad), lambda bi, li: (0, 0)),
                pl.BlockSpec((1, C_pad), lambda bi, li: (0, 0)),
            ],
            out_specs=pl.BlockSpec((1, TL, C_pad), lambda bi, li: (bi, li, 0)),
            scratch_shapes=[pltpu.VMEM((2, C_pad), x.dtype)],
        ),
        compiler_params=pltpu.CompilerParams(
            dimension_semantics=("parallel", "arbitrary"),
            vmem_limit_bytes=32 * 1024 * 1024,
        ),
    )(x_in, w, b)

    if C_pad != C:
        out = out[:, :, :C]
    return out


def _reference(x, weight, bias):
    # Pure-JAX reference of the PyTorch forward.
    B, L, C = x.shape
    xp = jnp.pad(x, ((0, 0), (2, 0), (0, 0)))            # (B, L+2, C)
    w = jnp.transpose(weight[:, 0, :], (1, 0))            # (3, C)
    return (xp[:, 0:L, :] * w[0]
            + xp[:, 1:L + 1, :] * w[1]
            + xp[:, 2:L + 2, :] * w[2]
            + bias[None, None, :])


if __name__ == "__main__":
    key = jax.random.PRNGKey(0)
    kx, kw, kb, kx2 = jax.random.split(key, 4)

    C = 32
    bound = 1.0 / jnp.sqrt(3.0)
    weight = jax.random.uniform(kw, (C, 1, 3), minval=-bound, maxval=bound,
                                dtype=jnp.float32)
    bias = jax.random.uniform(kb, (C,), minval=-bound, maxval=bound,
                              dtype=jnp.float32)

    # Case 1: module-sized input (B=2, L=8, C=32) — single sequence tile.
    x1 = jax.random.normal(kx, (2, 8, C), dtype=jnp.float32)
    out1 = jax.block_until_ready(depthwise_conv(x1, weight, bias))
    ref1 = _reference(x1, weight, bias)
    assert out1.shape == x1.shape
    assert jnp.allclose(out1, ref1, atol=1e-5, rtol=1e-5)

    # Case 2: longer sequence with a forced small tile to exercise the cross-tile
    # halo carry (grid = (2, 4)).
    x2 = jax.random.normal(kx2, (2, 32, C), dtype=jnp.float32)
    out2 = jax.block_until_ready(depthwise_conv(x2, weight, bias, seq_tile=8))
    ref2 = _reference(x2, weight, bias)
    assert out2.shape == x2.shape
    assert jnp.allclose(out2, ref2, atol=1e-5, rtol=1e-5)

    print("KERNEL_OK")
</pallas_src>

<mosaic_0001>
module attributes {stable_mosaic.version = 11 : i64} {
  func.func @_dwconv_kernel(%arg0: i32, %arg1: i32, %arg2: memref<1x8x128xf32, #tpu.memory_space<vmem>>, %arg3: memref<3x128xf32, #tpu.memory_space<vmem>>, %arg4: memref<1x128xf32, #tpu.memory_space<vmem>>, %arg5: memref<1x8x128xf32, #tpu.memory_space<vmem>>, %arg6: memref<2x128xf32, #tpu.memory_space<vmem>>) attributes {dimension_semantics = [#tpu.dimension_semantics<parallel>, #tpu.dimension_semantics<arbitrary>], iteration_bounds = array<i64: 2, 1>, scalar_prefetch = 0 : i64, scratch_operands = 1 : i64, tpu.core_type = #tpu.core_type<tc>, window_params = [{transform_indices = @transform_0, window_bounds = array<i64: 1, 8, 128>}, {pipeline_mode = #tpu.pipeline_mode<synchronous>, transform_indices = @transform_1, window_bounds = array<i64: 3, 128>}, {pipeline_mode = #tpu.pipeline_mode<synchronous>, transform_indices = @transform_2, window_bounds = array<i64: 1, 128>}, {transform_indices = @transform_3, window_bounds = array<i64: 1, 8, 128>}]} {
    %c0_i32 = arith.constant 0 : i32
    %0 = arith.cmpi eq, %arg1, %c0_i32 : i32
    %1 = arith.extui %0 : i1 to i32
    %c0_i32_0 = arith.constant 0 : i32
    %2 = arith.cmpi ne, %1, %c0_i32_0 : i32
    scf.if %2 {
      %cst = arith.constant 0.000000e+00 : f32
      %31 = vector.broadcast %cst : f32 to vector<2x128xf32>
      %c0_14 = arith.constant 0 : index
      %c0_15 = arith.constant 0 : index
      %32 = vector.load %arg6[%c0_14, %c0_15] : memref<2x128xf32, #tpu.memory_space<vmem>>, vector<2x128xf32>
      tpu.vector_store %arg6[%c0_14, %c0_15], %31 {strides = array<i32>} : memref<2x128xf32, #tpu.memory_space<vmem>>, vector<2x128xf32>,
    } else {
    }
    %c0 = arith.constant 0 : index
    %c0_1 = arith.constant 0 : index
    %c0_2 = arith.constant 0 : index
    %3 = vector.load %arg2[%c0, %c0_1, %c0_2] : memref<1x8x128xf32, #tpu.memory_space<vmem>>, vector<1x8x128xf32>
    %4 = vector.shape_cast %3 : vector<1x8x128xf32> to vector<8x128xf32>
    %c0_3 = arith.constant 0 : index
    %c0_4 = arith.constant 0 : index
    %5 = vector.load %arg6[%c0_3, %c0_4] : memref<2x128xf32, #tpu.memory_space<vmem>>, vector<2x128xf32>
    %6 = vector.extract_strided_slice %5 {offsets = [1, 0], sizes = [1, 128], strides = [1, 1]} : vector<2x128xf32> to vector<1x128xf32>
    %7 = vector.extract_strided_slice %4 {offsets = [0, 0], sizes = [7, 128], strides = [1, 1]} : vector<8x128xf32> to vector<7x128xf32>
    %8 = tpu.concatenate %6, %7 in 0 : vector<1x128xf32>, vector<7x128xf32> -> vector<8x128xf32>
    %9 = vector.extract_strided_slice %4 {offsets = [0, 0], sizes = [6, 128], strides = [1, 1]} : vector<8x128xf32> to vector<6x128xf32>
    %10 = tpu.concatenate %5, %9 in 0 : vector<2x128xf32>, vector<6x128xf32> -> vector<8x128xf32>
    %c0_5 = arith.constant 0 : index
    %c0_6 = arith.constant 0 : index
    %11 = vector.load %arg3[%c0_5, %c0_6] : memref<3x128xf32, #tpu.memory_space<vmem>>, vector<3x128xf32>
    %c0_7 = arith.constant 0 : index
    %c0_8 = arith.constant 0 : index
    %12 = vector.load %arg4[%c0_7, %c0_8] : memref<1x128xf32, #tpu.memory_space<vmem>>, vector<1x128xf32>
    %13 = vector.extract_strided_slice %11 {offsets = [0, 0], sizes = [1, 128], strides = [1, 1]} : vector<3x128xf32> to vector<1x128xf32>
    %14 = vector.broadcast %13 : vector<1x128xf32> to vector<8x128xf32>
    %15 = arith.mulf %10, %14 : vector<8x128xf32>
    %16 = vector.extract_strided_slice %11 {offsets = [1, 0], sizes = [1, 128], strides = [1, 1]} : vector<3x128xf32> to vector<1x128xf32>
    %17 = vector.broadcast %16 : vector<1x128xf32> to vector<8x128xf32>
    %18 = arith.mulf %8, %17 : vector<8x128xf32>
    %19 = arith.addf %15, %18 : vector<8x128xf32>
    %20 = vector.extract_strided_slice %11 {offsets = [2, 0], sizes = [1, 128], strides = [1, 1]} : vector<3x128xf32> to vector<1x128xf32>
    %21 = vector.broadcast %20 : vector<1x128xf32> to vector<8x128xf32>
    %22 = arith.mulf %4, %21 : vector<8x128xf32>
    %23 = arith.addf %19, %22 : vector<8x128xf32>
    %24 = vector.broadcast %12 : vector<1x128xf32> to vector<8x128xf32>
    %25 = arith.addf %23, %24 : vector<8x128xf32>
    %c0_9 = arith.constant 0 : index
    %c0_10 = arith.constant 0 : index
    %c0_11 = arith.constant 0 : index
    %26 = vector.load %arg5[%c0_9, %c0_10, %c0_11] : memref<1x8x128xf32, #tpu.memory_space<vmem>>, vector<1x8x128xf32>
    %27 = vector.shape_cast %26 : vector<1x8x128xf32> to vector<8x128xf32>
    %28 = vector.shape_cast %25 : vector<8x128xf32> to vector<1x8x128xf32>
    tpu.vector_store %arg5[%c0_9, %c0_10, %c0_11], %28 {strides = array<i32>} : memref<1x8x128xf32, #tpu.memory_space<vmem>>, vector<1x8x128xf32>,
    %29 = vector.extract_strided_slice %4 {offsets = [6, 0], sizes = [2, 128], strides = [1, 1]} : vector<8x128xf32> to vector<2x128xf32>
    %c0_12 = arith.constant 0 : index
    %c0_13 = arith.constant 0 : index
    %30 = vector.load %arg6[%c0_12, %c0_13] : memref<2x128xf32, #tpu.memory_space<vmem>>, vector<2x128xf32>
    tpu.vector_store %arg6[%c0_12, %c0_13], %29 {strides = array<i32>} : memref<2x128xf32, #tpu.memory_space<vmem>>, vector<2x128xf32>,
    return
  }
  func.func @transform_0(%arg0: i32, %arg1: i32) -> (i32, i32, i32) {
    %c0_i32 = arith.constant 0 : i32
    %c0_i32_0 = arith.constant 0 : i32
    return %arg0, %arg1, %c0_i32 : i32, i32, i32
  }
  func.func @transform_1(%arg0: i32, %arg1: i32) -> (i32, i32) {
    %c0_i32 = arith.constant 0 : i32
    %c0_i32_0 = arith.constant 0 : i32
    %c0_i32_1 = arith.constant 0 : i32
    return %c0_i32, %c0_i32_0 : i32, i32
  }
  func.func @transform_2(%arg0: i32, %arg1: i32) -> (i32, i32) {
    %c0_i32 = arith.constant 0 : i32
    %c0_i32_0 = arith.constant 0 : i32
    %c0_i32_1 = arith.constant 0 : i32
    return %c0_i32, %c0_i32_0 : i32, i32
  }
  func.func @transform_3(%arg0: i32, %arg1: i32) -> (i32, i32, i32) {
    %c0_i32 = arith.constant 0 : i32
    %c0_i32_0 = arith.constant 0 : i32
    return %arg0, %arg1, %c0_i32 : i32, i32, i32
  }
}

</mosaic_0001>

<bundles_post_ra>
// kernel: tpu_custom_call.1
= control target key start
LH: loop header
LB: loop body
LE: loop exit
PB: predicated region body
PF: predicated region fallthrough
CT: control target
= control target key end

     0   :  { %8 = vsyncpa [#allocation4], 0  ;;  %s778_s0 = inlined_call_operand.hbm [shape: f32[2,8,128], index: 0, kind: input, shape index: {}]   ;;  %s779_s1 = inlined_call_operand.hbm [shape: f32[3,128], index: 1, kind: input, shape index: {}]   ;;  %s780_s2 = inlined_call_operand.vmem [shape: f32[1,128], index: 2, kind: input, shape index: {}]   ;;  %s781_s3 = inlined_call_operand.hbm [shape: f32[2,8,128], index: 3, kind: output, shape index: {}]  }
   0x1   :  { %10 = vsyncpa [#allocation4 + $0x1], 0 }
   0x2   :  { %11 = vsyncpa [#allocation7], 0 }
   0x3   :  { %12 = vsyncpa [#allocation5], 0 }
   0x4   :  { %14 = vsyncpa [#allocation5 + $0x1], 0  ;;  %s622_s12 = smov 0   ;;  %s624_s13 = smov 0  }
   0x5   :  { %s626_s14 = smov 0   ;;  %s628_s15 = smov 0  }
   0x6   :  { %s630_s16 = smov 0   ;;  %s632_s17 = smov 0  }
   0x7 LB: > { %s362_s18 = sadd.s32 4294967295, %s598_s17   ;;  %s363_s19 = sadd.s32 4294967294, %s598_s17   ;;  %s598_s17 = sphi %s632_s17, %s20_s17   ;;  %s594_s16 = sphi %s630_s16, %s793_s16   ;;  %s590_s15 = sphi %s628_s15, %s792_s15   ;;  %s586_s14 = sphi %s626_s14, %s791_s14   ;;  %s582_s13 = sphi %s624_s13, %s790_s13   ;;  %s578_s12 = sphi %s622_s12, %s789_s12  }
   0x8   : > { %p54_p0 = scmp.ne.s32.totalorder %s582_s13, %s578_s12  ;;  %p656_p1 = scmp.eq.s32.totalorder %s362_s18, 0 }
   0x9   : > { %p660_p2 = scmp.eq.s32.totalorder %s362_s18, 1  ;;  %p128_p3 = scmp.eq.s32.totalorder %s363_s19, 1 }
   0xa   : > { %p666_p4 = por %p656_p1, %p54_p0  ;;  %p364_p5 = scmp.ge.s32.totalorder %s598_s17, 1 }
   0xb   : > { %p671_p6 = por %p128_p3, %p54_p0  ;;  %p135_p7 = scmp.lt.s32.totalorder %s598_s17, 3 }
   0xc   : > { %s147_s26 = sshll.u32 %s779_s1, 4  ;;  %p366_p9 = scmp.ge.s32.totalorder %s598_s17, 2  ;;  %s148_s26 = int_to_ptr.hbm [resolvable:$true] %s147_s26 }
   0xd   : > { %p679_p8 = pnand %p364_p5, %p135_p7  ;;  %s600_s28 = smov [#allocation6]  }
   0xe   : > { %s149_s29 = sshll.u32 %s600_s28, 4  ;;  %s32_s30 = sadd.s32 1, %s594_s16  ;;  %s150_s29 = int_to_ptr.vmem [resolvable:$true] %s149_s29 }
   0xf   : > { %p385_p10 = pneg %p679_p8  ;;  %p34_p12 = scmp.ge.s32.totalorder %s32_s30, 2 }
  0x10   : > { %s41_s4 = sadd.s32 1, %s586_s14  ;;  %p48_p13 = scmp.ne.s32.totalorder %s586_s14, %s582_s13 }
  0x11   : > { %p386_p11 = pnand %p385_p10, %p656_p1  ;;  %p49_p0 = scmp.eq.s32.totalorder %s598_s17, 0 }
  0x12   : > { %s795_s30 = smov (%p34_p12, %s32_s30), 0  ;;  %p701_p5 = por %p660_p2, %p48_p13 }
  0x13   : > { %388 = dma.hbm_to_vmem [thread:$0]  (!%p386_p11), %s148_s26, 64, %s150_s29, [#allocation7]  }
  0x14   : > { %p695_p3 = por %p49_p0, %p48_p13  ;;  %s36_s7 = ssub.s32 %s594_s16, %s795_s30 }
  0x15   : > { %p398_p7 = scmp.lt.s32.totalorder %s598_s17, 2  ;;  %p39_p10 = scmp.eq.s32.totalorder %s36_s7, 0 }
  0x16   : > { %s163_s8 = sand.u32 1, %s586_s14   ;;  %s368_s11 = sshll.u32 %s594_s16, 3 }
  0x17   : > { %s367_s9 = sshll.u32 %s163_s8, 3  ;;  %s172_s24 = scalar_lea.hbm %s778_s0, %s368_s11 }
  0x18   : > { %s710_s10 = scalar_select %p39_p10, %s586_s14, %s41_s4  }
  0x19   : > { %s167_s25 = scalar_lea.vmem [#allocation3], %s367_s9  ;;  %s174_s21 = sshll.u32 %s172_s24, 4  ;;  %s175_s21 = int_to_ptr.hbm [resolvable:$true] %s174_s21 }
  0x1a   : > { %s176_s26 = sshll.u32 %s167_s25, 4  ;;  %p390_p2 = pnand %p398_p7, %p695_p3  ;;  %s177_s26 = int_to_ptr.vmem [resolvable:$true] %s176_s26 }
  0x1b   : > { %s164_s28 = scalar_lea.sflag [#allocation4], %s163_s8  ;;  %185 = sbr.rel (%p679_p8) target bundleno = 58 (0x3a), region = 32 }
  0x1c   : > { %392 = dma.hbm_to_vmem [thread:$0]  (!%p390_p2), %s175_s21, 128, %s177_s26, %s164_s28  }
  0x1d   : > { %s721_s29 = sand.u32 (!%p679_p8), 1, %s582_s13  }
  0x1e   : > { %s370_s4 = sshll.u32 (!%p679_p8), %s721_s29, 3  ;;  %s188_s7 = scalar_lea.sflag (!%p679_p8), [#allocation4], %s721_s29 }
  0x1f   : > { %s191_s9 = scalar_lea.vmem (!%p679_p8), [#allocation3], %s370_s4 }
  0x20   : > { %565 = dma.done.wait (%p666_p4), %s188_s7, 128  }
  0x21   : > { %567 = vsyncadd (%p666_p4), %s188_s7, 4294967168 }
  0x22   : > { %569 = dma.done.wait (%p656_p1), [#allocation7], 64  }
  0x23   : > { %571 = vsyncadd (%p656_p1), [#allocation7], 4294967232  ;;  %v601_v0 = vmov 0.0   ;;  %vm233_vm0 = vcmask 1040384   ;;  %v225_v1 = vld [vmem:[%s191_s9] sm:$0xff]  ;;  %vm237_vm1 = vcmask 1041408  }
  0x24   : > { %224 = vst [vmem:[#allocation2] sm:$0x3] %v601_v0  ;;  %v239_v2 = vld [vmem:[#allocation6] sm:$0x7]  ;;  %v231_v4 = vrot.slane %v225_v1, 7  ;;  %v235_v5 = vrot.slane %v225_v1, 6 }
  0x25   : > { %v241_v6 = vperm.slane %v239_v2, 0  ;;  %v243_v7 = vperm.slane %v239_v2, 1  ;;  %v246_v9 = vperm.slane %v239_v2, 2  ;;  %s374_s22 = sshll.u32 %s590_s15, 3  ;;  %v451_v16 = vld [vmem:[%s780_s2] ss:$0 sm:$0xff] }
  0x26   : > { %s267_s5 = scalar_lea.hbm %s781_s3, %s374_s22  ;;  %s219_s18 = scalar_lea.vmem [#allocation8], %s370_s4 }
  0x27   : > { %v247_v14 = vmul.f32 %v246_v9, %v225_v1  ;;  %s269_s19 = sshll.u32 %s219_s18, 4  ;;  %s271_s15 = sshll.u32 %s267_s5, 4  ;;  %s270_s19 = int_to_ptr.vmem [resolvable:$true] %s269_s19  ;;  %s272_s15 = int_to_ptr.hbm [resolvable:$true] %s271_s15 }
  0x28   : > { %s256_s24 = scalar_lea.sflag [#allocation5], %s721_s29  ;;  %s526_s25 = sshra.s32 %s272_s15, 4  ;;  %s527_s25 = int_to_ptr.hbm [resolvable:$true] %s526_s25 }
  0x29   : > { %s528_s26 = scalar_lea.hbm %s527_s25, 8  ;;  %s532_s7 = scalar_lea.hbm %s781_s3, 16 }
  0x2a   : > { %p529_p1 = scmp.ne.s32.totalorder %s527_s25, %s528_s26  ;;  %p533_p11 = scmp.lt.s32.totalorder %s527_s25, %s781_s3 }
  0x2b   : > { %v226_v3 = vld [vmem:[#allocation2] sm:$0x3]  ;;  %p534_p12 = scmp.lt.s32.totalorder %s532_s7, %s528_s26 }
  0x2c   : > { %v228_v8 = vrot.slane %v226_v3, 1  ;;  %254 = vst [vmem:[#allocation2 - $0x6] sm:$0xc0] %v225_v1  ;;  %v238_v10 = vsel %vm237_vm1, %v226_v3, %v235_v5  ;;  %p530_p4 = pnand %p529_p1, %p701_p5 }
  0x2d   : > { %v242_v12 = vmul.f32 %v241_v6, %v238_v10  ;;  %p535_p13 = por %p534_p12, %p533_p11 }
  0x2e   : > { %v234_v11 = vsel %vm233_vm0, %v228_v8, %v231_v4  ;;  %p531_p8 = pneg %p530_p4 }
  0x2f   : > { %v244_v13 = vmul.f32 %v243_v7, %v234_v11 }
  0x30   : > { %p536_p0 = pnand %p535_p13, %p531_p8 }
  0x31   : > { %v245_v15 = vadd.f32 %v244_v13, %v242_v12 }
  0x33   : > { %v248_v17 = vadd.f32 %v247_v14, %v245_v15 }
  0x35   : > { %v252_v18 = vadd.f32 %v451_v16, %v248_v17 }
  0x37   : > { %253 = vst [vmem:[%s219_s18] sm:$0xff] %v252_v18 }
  0x38   : > { %539 = shalt.err (!%p536_p0)
}
  0x39   : > { %383 = dma.vmem_to_hbm [thread:$0]  (%p701_p5), %s270_s19, 128, %s272_s15, %s256_s24  }
  0x3a PF: > { %s283_s29 = sand.u32 1, %s578_s12   ;;  %p394_p3 = pnand %p366_p9, %p671_p6 }
  0x3b   : > { %s284_s22 = scalar_lea.sflag [#allocation5], %s283_s29 }
  0x3c   : > { %p395_p7 = pneg %p394_p3 }
  0x3e   : > { %573 = dma.done.wait (%p395_p7), %s284_s22, 128  }
  0x3f   : > { %575 = vsyncadd (%p395_p7), %s284_s22, 4294967168  ;;  %s20_s17 = sadd.s32 1, %s598_s17   ;;  %s789_s12 = smov %s582_s13 }
  0x40   : > { %p17_p10 = scmp.ge.s32.totalorder %s20_s17, 4   ;;  %s790_s13 = smov %s586_s14 }
  0x41   : > { %s791_s14 = smov %s710_s10  ;;  %s792_s15 = smov %s594_s16 }
  0x42   : > { %s793_s16 = smov %s795_s30  ;;  %19 = sbr.rel (!%p17_p10) target bundleno = 7 (0x7), region = 85 }
  0x47   :  { %290 = vsyncpa [#allocation4], 1 }
  0x48   :  { %292 = vsyncpa [#allocation4 + $0x1], 1 }
  0x49   :  { %293 = vsyncpa [#allocation7], 1 }
  0x4a   :  { %294 = vsyncpa [#allocation5], 1 }
  0x4b   :  { %296 = vsyncpa [#allocation5 + $0x1], 1 }

</bundles_post_ra>
